<compile_context>
chip_gen: v6e
topology: v6e:2x2x1
jax: 0.10.0
libtpu: 0.0.40
codegen_flags: <defaults>
</compile_context>

<pallas_src>
import functools

import jax
import jax.numpy as jnp
from jax.experimental import pallas as pl
from jax.experimental.pallas import tpu as pltpu

_LANES = 128
_MAX_TILE_ROWS = 4096      # 4096*128 samples * 4 B = 2 MB streamed per grid step
_PAD_VALUE = -1.0e4        # softplus(_PAD_VALUE) == 0 exactly in f32


def _round_up(a, b):
    return ((a + b - 1) // b) * b


def _num_tensorcores():
    """TensorCores a single Pallas kernel can shard a 'parallel' grid axis over."""
    try:
        kind = jax.devices()[0].device_kind.lower()
    except Exception:
        return 1
    # v7x has 2 TensorCores per chip; v5e/v6e have 1 (splitting there only adds steps).
    return 2 if "v7" in kind else 1


def _ce_invarse_kernel(d_ref, o_ref):
    # d_ref: (TR, 128) f32 signed logit differences; per-sample nll = softplus(d)
    # o_ref: (8, 128)  f32 per-split partial-sum accumulator (resident across axis 1)
    i = pl.program_id(1)

    @pl.when(i == 0)
    def _():
        o_ref[...] = jnp.zeros_like(o_ref)

    d = d_ref[...]
    # Numerically stable softplus; padded entries (d = -1e4) contribute exactly 0,
    # so no tail mask is needed.
    nll = jnp.maximum(d, 0.0) + jnp.log(1.0 + jnp.exp(-jnp.abs(d)))

    # (TR,128) -> (8,128) partial sums: layout-preserving reshape + pure VPU adds,
    # no cross-lane reduce in-kernel; the final tiny reduction happens in XLA.
    tr = d.shape[0]
    o_ref[...] += jnp.sum(nll.reshape(tr // 8, 8, _LANES), axis=0)


@functools.partial(jax.jit, static_argnames=("reduction_flag",))
def ce_invarse(x, target, weight, reduction_flag=False):
    """JAX/Pallas equivalent of CEInvarse.forward(x, target).

    x:      (N, 2) logits (f32 or bf16)
    target: (N,)   int labels in {0, 1}
    weight: (2,)   inverse-frequency class weights
    """
    n, c = x.shape
    if c != 2:
        raise ValueError("CEInvarse is a 2-class loss; x must be (N, 2).")

    # --- fused relayout in XLA: one pass reading x/target, writing N f32 values ---
    #   nll_i = log(exp(x0)+exp(x1)) - x_{t_i} = softplus(x_other - x_t)
    # Keep the subtraction in f32 (cancellation when x0 ~= x1), even for bf16 inputs.
    x32 = x.astype(jnp.float32)
    t = target.astype(jnp.int32)
    diff = x32[:, 1] - x32[:, 0]
    d = jnp.where(t == 0, diff, -diff)

    # --- tiling over samples (samples mapped to sublane x lane) ---
    rows = pl.cdiv(n, _LANES)
    n_cores = _num_tensorcores()
    splits = n_cores if (n_cores > 1 and rows >= 2 * 8 * n_cores) else 1
    tile_rows = min(_MAX_TILE_ROWS, _round_up(pl.cdiv(rows, splits), 8))
    tiles_per_split = pl.cdiv(rows, splits * tile_rows)
    rows_pad = splits * tiles_per_split * tile_rows
    n_pad = rows_pad * _LANES

    d_pad = jnp.pad(d, (0, n_pad - n), constant_values=_PAD_VALUE)
    d2 = d_pad.reshape(rows_pad, _LANES)

    partials = pl.pallas_call(
        _ce_invarse_kernel,
        out_shape=jax.ShapeDtypeStruct((splits * 8, _LANES), jnp.float32),
        grid=(splits, tiles_per_split),
        in_specs=[
            pl.BlockSpec((tile_rows, _LANES),
                         lambda s, i: (s * tiles_per_split + i, 0)),
        ],
        out_specs=pl.BlockSpec((8, _LANES), lambda s, i: (s, 0)),
        compiler_params=pltpu.CompilerParams(
            dimension_semantics=("parallel", "arbitrary")),
    )(d2)

    # Scalar epilogue in XLA: mean over the TRUE N, weight[target[0]], optional /sum(w).
    ce = jnp.sum(partials) / jnp.float32(n)
    w = weight.astype(jnp.float32)
    # NOTE: weight[target[0]] (first sample's class weight only) reproduces the
    # torch module's semantics exactly.
    out = w[t[0]] * ce
    if reduction_flag:
        out = out / jnp.sum(w)
    return out


def _reference(x, target, weight, reduction_flag):
    # Pure-JAX reference mirroring torch semantics.
    logp = jax.nn.log_softmax(x.astype(jnp.float32), axis=-1)
    nll = -jnp.take_along_axis(logp, target[:, None].astype(jnp.int32), axis=-1)[:, 0]
    ce = jnp.mean(nll)
    out = weight[target[0]] * ce
    if reduction_flag:
        out = out / jnp.sum(weight)
    return out


if __name__ == "__main__":
    key = jax.random.PRNGKey(0)

    # Module setup: class_num_list = [n_RIGHT, n_LEFT] -> 2 classes.
    n_right, n_left = 3, 5
    total = n_right + n_left
    weight = jnp.array(
        [1.0 / (n_right / total), 1.0 / (n_left / total)], dtype=jnp.float32)

    ok = True
    for n in (8, 1000):
        kx, kt = jax.random.split(jax.random.fold_in(key, n))
        x = jax.random.normal(kx, (n, 2), dtype=jnp.float32)
        target = jax.random.randint(kt, (n,), 0, 2, dtype=jnp.int32)
        for flag in (False, True):
            out = jax.block_until_ready(
                ce_invarse(x, target, weight, reduction_flag=flag))
            ref = _reference(x, target, weight, flag)
            if not jnp.allclose(out, ref, rtol=1e-4, atol=1e-5):
                ok = False

    # bf16 logits exercise the upcast-before-subtraction path.
    kx, kt = jax.random.split(jax.random.fold_in(key, 77))
    xb = jax.random.normal(kx, (512, 2), dtype=jnp.float32).astype(jnp.bfloat16)
    tb = jax.random.randint(kt, (512,), 0, 2, dtype=jnp.int32)
    out = jax.block_until_ready(ce_invarse(xb, tb, weight))
    ref = _reference(xb.astype(jnp.float32), tb, weight, False)
    if not jnp.allclose(out, ref, rtol=1e-4, atol=1e-4):
        ok = False

    if ok:
        print("KERNEL_OK")
</pallas_src>

<mosaic_0001>
module attributes {stable_mosaic.version = 11 : i64} {
  func.func @_ce_invarse_kernel(%arg0: i32, %arg1: i32, %arg2: memref<8x128xf32, #tpu.memory_space<vmem>>, %arg3: memref<8x128xf32, #tpu.memory_space<vmem>>) attributes {dimension_semantics = [#tpu.dimension_semantics<parallel>, #tpu.dimension_semantics<arbitrary>], iteration_bounds = array<i64: 1, 1>, scalar_prefetch = 0 : i64, scratch_operands = 0 : i64, tpu.core_type = #tpu.core_type<tc>, window_params = [{transform_indices = @transform_0, window_bounds = array<i64: 8, 128>}, {transform_indices = @transform_1, window_bounds = array<i64: 8, 128>}]} {
    %c0_i32 = arith.constant 0 : i32
    %0 = arith.cmpi eq, %arg1, %c0_i32 : i32
    %1 = arith.extui %0 : i1 to i32
    %c0_i32_0 = arith.constant 0 : i32
    %2 = arith.cmpi ne, %1, %c0_i32_0 : i32
    scf.if %2 {
      %cst_9 = arith.constant 0.000000e+00 : f32
      %19 = vector.broadcast %cst_9 : f32 to vector<8x128xf32>
      %c0_10 = arith.constant 0 : index
      %c0_11 = arith.constant 0 : index
      %20 = vector.load %arg3[%c0_10, %c0_11] : memref<8x128xf32, #tpu.memory_space<vmem>>, vector<8x128xf32>
      tpu.vector_store %arg3[%c0_10, %c0_11], %19 {strides = array<i32>} : memref<8x128xf32, #tpu.memory_space<vmem>>, vector<8x128xf32>,
    } else {
    }
    %c0 = arith.constant 0 : index
    %c0_1 = arith.constant 0 : index
    %3 = vector.load %arg2[%c0, %c0_1] : memref<8x128xf32, #tpu.memory_space<vmem>>, vector<8x128xf32>
    %cst = arith.constant 0.000000e+00 : f32
    %4 = vector.broadcast %cst : f32 to vector<8x128xf32>
    %5 = arith.maximumf %3, %4 : vector<8x128xf32>
    %6 = math.absf %3 : vector<8x128xf32>
    %cst_2 = arith.constant 0.000000e+00 : f32
    %7 = vector.broadcast %cst_2 : f32 to vector<8x128xf32>
    %8 = arith.subf %7, %6 : vector<8x128xf32>
    %9 = math.exp %8 : vector<8x128xf32>
    %cst_3 = arith.constant 1.000000e+00 : f32
    %10 = vector.broadcast %cst_3 : f32 to vector<8x128xf32>
    %11 = arith.addf %10, %9 : vector<8x128xf32>
    %12 = math.log %11 : vector<8x128xf32>
    %13 = arith.addf %5, %12 : vector<8x128xf32>
    %c0_4 = arith.constant 0 : index
    %c0_5 = arith.constant 0 : index
    %14 = vector.load %arg3[%c0_4, %c0_5] : memref<8x128xf32, #tpu.memory_space<vmem>>, vector<8x128xf32>
    %15 = vector.shape_cast %13 : vector<8x128xf32> to vector<1x8x128xf32>
    %cst_6 = arith.constant dense<0.000000e+00> : vector<8x128xf32>
    %16 = vector.multi_reduction <add>, %15, %cst_6 [0] : vector<1x8x128xf32> to vector<8x128xf32>
    %17 = arith.addf %14, %16 : vector<8x128xf32>
    %c0_7 = arith.constant 0 : index
    %c0_8 = arith.constant 0 : index
    %18 = vector.load %arg3[%c0_7, %c0_8] : memref<8x128xf32, #tpu.memory_space<vmem>>, vector<8x128xf32>
    tpu.vector_store %arg3[%c0_7, %c0_8], %17 {strides = array<i32>} : memref<8x128xf32, #tpu.memory_space<vmem>>, vector<8x128xf32>,
    return
  }
  func.func @transform_0(%arg0: i32, %arg1: i32) -> (i32, i32) {
    %c1_i32 = arith.constant 1 : i32
    %0 = arith.muli %arg0, %c1_i32 : i32
    %1 = arith.addi %0, %arg1 : i32
    %c0_i32 = arith.constant 0 : i32
    %c0_i32_0 = arith.constant 0 : i32
    return %1, %c0_i32 : i32, i32
  }
  func.func @transform_1(%arg0: i32, %arg1: i32) -> (i32, i32) {
    %c0_i32 = arith.constant 0 : i32
    %c0_i32_0 = arith.constant 0 : i32
    return %arg0, %c0_i32 : i32, i32
  }
}

</mosaic_0001>

<bundles_post_ra>
// kernel: ce_invarse.1
= control target key start
LH: loop header
LB: loop body
LE: loop exit
PB: predicated region body
PF: predicated region fallthrough
CT: control target
= control target key end

     0   :  { %s75_s0 = inlined_call_operand.vmem [shape: f32[8,128], index: 0, kind: input, shape index: {}]   ;;  %s76_s1 = inlined_call_operand.vmem [shape: f32[8,128], index: 1, kind: output, shape index: {}]  }
   0x1   :  { %v30_v0 = vld [vmem:[%s75_s0] sm:$0xff] }
   0x2   :  { %v32_v1 = vand.u32 2147483647, %v30_v0  ;;  %v31_v6 = vmax.f32 %v30_v0, 0.0 }
   0x4   :  { %v33_v2 = vsub.f32 0.0, %v32_v1 }
   0x6   :  { %v34_v3 = vmul.f32 1.442695, %v33_v2 }
   0x8   :  { %55 = vpow2.f32 %v34_v3 }
  0x15   :  { %v56_v4 = vpop.eup %55 }
  0x16   :  { %v36_v5 = vadd.f32 1.0, %v56_v4 }
  0x18   :  { %57 = vlog2.f32 %v36_v5 }
  0x25   :  { %v58_v7 = vpop.eup %57 }
  0x26   :  { %v38_v8 = vmul.f32 0.6931472, %v58_v7 }
  0x28   :  { %v39_v9 = vadd.f32 %v38_v8, %v31_v6 }
  0x2a   :  { %43 = vst [vmem:[%s76_s1] sm:$0xff] %v39_v9 }

</bundles_post_ra>
